<compile_context>
chip_gen: v7x
topology: tpu7x:2x2x1
jax: 0.10.0
libtpu: 0.0.40
codegen_flags: <defaults>
</compile_context>

<pallas_src>
import math
import functools

import jax
import jax.numpy as jnp
from jax import lax
from jax.experimental import pallas as pl
from jax.experimental.pallas import tpu as pltpu

_OPAD = 128  # lane-dense padding for the MLP hidden / output widths


def _round_up(x, m):
    return (x + m - 1) // m * m


def _dec_mtan_kernel(ts_ref, se_ref, so_ref, v_ref, out_ref, *,
                     n_batch, t_len, d_in, d_pad, w, masked):
    tt = ts_ref[...]                                   # (B*T, 1) raw decode times

    # ---- attention slab (lane width W): small vectors + wq_sin + K^T ----
    vecs = se_ref[0:8, :]                              # (8, W)
    q_row0, q_bias = vecs[0:1, :], vecs[1:2, :]
    w_per, b_per = vecs[2:3, :], vecs[3:4, :]
    wq_sin = se_ref[8:8 + w, :]                        # (W, W)  (zero-padded)
    k_t = se_ref[8 + w:8 + 2 * w, :]                   # (W, W)  K^T, zero-padded

    # Fused time-embedding + 1/sqrt(E)-scaled query projection:
    #   Q/sqrt(E) = (tt*w_lin+b_lin)*wq_s[0] + sin(tt*w_per+b_per) @ wq_s[1:] + bq_s
    s = jnp.sin(tt * w_per + b_per)                    # (B*T, W)   sin -> EUP slot
    q = tt * q_row0 + q_bias + jnp.dot(
        s, wq_sin, preferred_element_type=jnp.float32)

    # Attention scores against the precomputed, pre-transposed key matrix.
    scores = jnp.dot(q, k_t, preferred_element_type=jnp.float32)   # (B*T, W)
    if masked:                                         # kill padded reference cols
        scores = scores + vecs[4:5, :]                 # 0 / -1e30 mask row
    m = jnp.max(scores, axis=-1, keepdims=True)
    e = jnp.exp(scores - m)                            # unnormalized numerator
    inv_l = 1.0 / jnp.sum(e, axis=-1, keepdims=True)   # (B*T, 1) exact

    # Single batched e @ V; softmax normalization deferred past the contraction.
    e3 = e.reshape(n_batch, t_len, w)
    x3 = lax.dot_general(e3, v_ref[...], (((2,), (1,)), ((0,), (0,))),
                         preferred_element_type=jnp.float32)        # (B, T, D)
    x = x3.reshape(n_batch * t_len, d_in) * inv_l                   # (B*T, D)

    # ---- MLP slab: fused (Wo -> decoder -> W1) + ReLU + padded output layer ----
    w_pre = so_ref[0:d_in, :]                          # (D, 128)
    w2 = so_ref[d_pad:d_pad + _OPAD, :]                # (128, 128)
    b_pre = so_ref[d_pad + _OPAD:d_pad + _OPAD + 1, :]
    b_out = so_ref[d_pad + _OPAD + 1:d_pad + _OPAD + 2, :]
    h = jnp.maximum(
        jnp.dot(x, w_pre, preferred_element_type=jnp.float32) + b_pre, 0.0)
    y = jnp.dot(h, w2, preferred_element_type=jnp.float32) + b_out  # (B*T, 128)

    out_ref[...] = y.reshape(n_batch, t_len, _OPAD)    # lane-dense 3-D store


def _learn_time_embedding(tt, params):
    # tt: (..., T) -> (..., T, E).  Linear(1,1) and Linear(1, E-1) are scalar
    # scale + bias, so plain broadcasts (prepare-time glue only).
    tt = tt[..., None]
    out1 = tt * params["w_lin"] + params["b_lin"]                 # (..., T, 1)
    out2 = jnp.sin(tt * params["w_per"] + params["b_per"])        # (..., T, E-1)
    return jnp.concatenate([out1, out2], axis=-1)


def make_dec_mtan_forward(params, query_times):
    """One-time prepare: folds all parameter-derived constants into two packed
    slabs and returns a jitted forward(enc_output, time_steps) callable."""
    f32 = jnp.float32
    E = params["wq"].shape[0]
    D = params["wo"].shape[0]
    HID = params["w1"].shape[1]
    OUT = params["w2"].shape[1]
    T_ref = query_times.shape[0]
    W = _round_up(max(E, T_ref), 8)     # shared row/lane pad of the attention slab
    DP = _round_up(D, 8)                # row pad of the fused pre-MLP weight block
    assert HID <= _OPAD and OUT <= _OPAD

    # --- fold 1/sqrt(E) attention scale into the query projection ---
    scale = 1.0 / math.sqrt(E)
    wq_s = params["wq"] * scale
    bq_s = params["bq"] * scale

    # --- batch-invariant K^T = (emb(self.query) @ Wk + bk)^T (hoisted, pre-T) ---
    q_emb = _learn_time_embedding(query_times[None, :], params)[0]   # (T_ref, E)
    k_t = (q_emb @ params["wk"] + params["bk"]).T                    # (E, T_ref)

    # --- fused time-embedding -> scaled query projection parameters ---
    q_row0 = params["w_lin"] * wq_s[0, :]                            # (E,)
    q_bias = params["b_lin"] * wq_s[0, :] + bq_s                     # (E,)
    w_per = jnp.concatenate([jnp.zeros((1,), f32), params["w_per"]])
    b_per = jnp.concatenate([jnp.zeros((1,), f32), params["b_per"]])
    wq_sin = wq_s.at[0, :].set(0.0)                                  # (E, E)

    # --- attention slab (lane width W), rows:
    #     [0:8)      q_row0 / q_bias / w_per / b_per / score-mask (row 4)
    #     [8:8+W)    wq_sin zero-padded
    #     [8+W:8+2W) K^T    zero-padded
    slab_e = jnp.zeros((8 + 2 * W, W), f32)
    slab_e = slab_e.at[0, :E].set(q_row0)
    slab_e = slab_e.at[1, :E].set(q_bias)
    slab_e = slab_e.at[2, :E].set(w_per)
    slab_e = slab_e.at[3, :E].set(b_per)
    masked = T_ref < W
    if masked:
        slab_e = slab_e.at[4, T_ref:].set(-1e30)
    slab_e = slab_e.at[8:8 + E, :E].set(wq_sin)
    slab_e = slab_e.at[8 + W:8 + W + E, :T_ref].set(k_t)

    # --- algebraic fusion of Wo -> decoder -> W1 (purely linear chain) ---
    w_pre = params["wo"] @ params["wdec"] @ params["w1"]             # (D, HID)
    b_pre = ((params["bo"] @ params["wdec"] + params["bdec"]) @ params["w1"]
             + params["b1"])

    # --- MLP slab (lane width 128), rows:
    #     [0:DP)           fused pre-MLP weight (D, HID), zero-padded
    #     [DP:DP+128)      W2 (HID, OUT), zero-padded (HID kept at 128 pad)
    #     [DP+128:DP+136)  [b_pre ; b2] zero-padded
    slab_o = jnp.zeros((DP + _OPAD + 8, _OPAD), f32)
    slab_o = slab_o.at[0:D, :HID].set(w_pre)
    slab_o = slab_o.at[DP:DP + HID, :OUT].set(params["w2"])
    slab_o = slab_o.at[DP + _OPAD, :HID].set(b_pre)
    slab_o = slab_o.at[DP + _OPAD + 1, :OUT].set(params["b2"])

    slab_e = jax.device_put(slab_e)
    slab_o = jax.device_put(slab_o)

    def forward(slab_e_, slab_o_, enc_output, time_steps):
        B = enc_output.shape[0]
        T = time_steps.shape[1]
        f32_ = jnp.float32

        ts2 = time_steps.reshape(B * T, 1).astype(f32_)
        v = enc_output.astype(f32_)
        if T_ref < W:  # pad reference axis so it matches the W score columns
            v = jnp.zeros((B, W, D), f32_).at[:, :T_ref, :].set(v)

        kernel = functools.partial(
            _dec_mtan_kernel, n_batch=B, t_len=T, d_in=D, d_pad=DP, w=W,
            masked=masked)

        y = pl.pallas_call(
            kernel,
            out_shape=jax.ShapeDtypeStruct((B, T, _OPAD), f32_),
            grid=(1,),
            in_specs=[
                pl.BlockSpec((B * T, 1), lambda i: (0, 0)),          # time steps
                pl.BlockSpec(slab_e_.shape, lambda i: (0, 0)),       # attn slab
                pl.BlockSpec(slab_o_.shape, lambda i: (0, 0)),       # MLP slab
                pl.BlockSpec(v.shape, lambda i: (0, 0, 0)),          # V=ENCoutput
            ],
            out_specs=pl.BlockSpec((B, T, _OPAD), lambda i: (0, 0, 0)),
            compiler_params=pltpu.CompilerParams(
                dimension_semantics=("arbitrary",)),
        )(ts2, slab_e_, slab_o_, v)

        return y[:, :, :OUT]

    fwd = jax.jit(forward)
    return functools.partial(fwd, slab_e, slab_o)


def reference_forward(params, enc_output, time_steps, query_times):
    # Pure-JAX reference mirroring the PyTorch forward (mask=None, num_heads=1).
    E = params["wq"].shape[0]
    key = _learn_time_embedding(time_steps, params)               # (B, T, E)
    qe = _learn_time_embedding(query_times[None, :], params)[0]   # (T_ref, E)
    Q = key @ params["wq"] + params["bq"]
    K = qe @ params["wk"] + params["bk"]
    scores = jnp.einsum("bte,re->btr", Q, K) / math.sqrt(E)
    p = jax.nn.softmax(scores, axis=-1)
    x = jnp.einsum("btr,brd->btd", p, enc_output)
    x = x @ params["wo"] + params["bo"]
    x = x @ params["wdec"] + params["bdec"]
    h = jax.nn.relu(x @ params["w1"] + params["b1"])
    return h @ params["w2"] + params["b2"]


def init_params(rng, input_dim, embed_time, hidden, outputdim):
    # Deterministic synthetic init (uniform +-1/sqrt(fan_in), like torch defaults).
    D, E = input_dim, embed_time
    names_shapes_fanin = [
        ("w_lin", (), 1), ("b_lin", (), 1),
        ("w_per", (E - 1,), 1), ("b_per", (E - 1,), 1),
        ("wq", (E, E), E), ("bq", (E,), E),
        ("wk", (E, E), E), ("bk", (E,), E),
        ("wo", (D, D), D), ("bo", (D,), D),
        ("wdec", (D, D), D), ("bdec", (D,), D),
        ("w1", (D, hidden), D), ("b1", (hidden,), D),
        ("w2", (hidden, outputdim), hidden), ("b2", (outputdim,), hidden),
    ]
    keys = jax.random.split(rng, len(names_shapes_fanin))
    params = {}
    for k, (name, shape, fan_in) in zip(keys, names_shapes_fanin):
        bound = 1.0 / math.sqrt(fan_in)
        params[name] = jax.random.uniform(
            k, shape, jnp.float32, minval=-bound, maxval=bound)
    return params


if __name__ == "__main__":
    B, T, T_REF = 2, 8, 16          # batch, decode time points, reference points
    D, E, HID, OUT = 4, 16, 50, 3   # input_dim, embed_time, hidden=50, outputdim

    root = jax.random.PRNGKey(0)
    k_par, k_enc, k_ts = jax.random.split(root, 3)

    params = init_params(k_par, D, E, HID, OUT)
    enc_output = jax.random.normal(k_enc, (B, T_REF, D), jnp.float32)
    time_steps = jnp.sort(jax.random.uniform(k_ts, (B, T), jnp.float32), axis=-1)
    query_times = jnp.linspace(0.0, 1.0, T_REF, dtype=jnp.float32)  # self.query

    # One-time prepare (all parameter-derived constants hoisted out of the hot path).
    dec_mtan_forward = make_dec_mtan_forward(params, query_times)

    out = dec_mtan_forward(enc_output, time_steps)
    out = jax.block_until_ready(out)

    ref = reference_forward(params, enc_output, time_steps, query_times)
    assert out.shape == (B, T, OUT)
    max_err = float(jnp.max(jnp.abs(out - ref)))
    assert max_err < 1e-4, f"mismatch vs reference: {max_err}"
    print("KERNEL_OK")
</pallas_src>

<mosaic_0001>
module attributes {stable_mosaic.version = 11 : i64} {
  func.func @_dec_mtan_kernel(%arg0: i32, %arg1: memref<16x1xf32, #tpu.memory_space<vmem>>, %arg2: memref<40x16xf32, #tpu.memory_space<vmem>>, %arg3: memref<144x128xf32, #tpu.memory_space<vmem>>, %arg4: memref<2x16x4xf32, #tpu.memory_space<vmem>>, %arg5: memref<2x8x128xf32, #tpu.memory_space<vmem>>) attributes {dimension_semantics = [#tpu.dimension_semantics<arbitrary>], iteration_bounds = array<i64: 1>, scalar_prefetch = 0 : i64, scratch_operands = 0 : i64, tpu.core_type = #tpu.core_type<tc>, window_params = [{pipeline_mode = #tpu.pipeline_mode<synchronous>, transform_indices = @transform_0, window_bounds = array<i64: 16, 1>}, {pipeline_mode = #tpu.pipeline_mode<synchronous>, transform_indices = @transform_1, window_bounds = array<i64: 40, 16>}, {pipeline_mode = #tpu.pipeline_mode<synchronous>, transform_indices = @transform_2, window_bounds = array<i64: 144, 128>}, {pipeline_mode = #tpu.pipeline_mode<synchronous>, transform_indices = @transform_3, window_bounds = array<i64: 2, 16, 4>}, {pipeline_mode = #tpu.pipeline_mode<synchronous>, transform_indices = @transform_4, window_bounds = array<i64: 2, 8, 128>}]} {
    %c0 = arith.constant 0 : index
    %c0_0 = arith.constant 0 : index
    %0 = vector.load %arg1[%c0, %c0_0] : memref<16x1xf32, #tpu.memory_space<vmem>>, vector<16x1xf32>
    %c0_1 = arith.constant 0 : index
    %c0_2 = arith.constant 0 : index
    %1 = vector.load %arg2[%c0_1, %c0_2] : memref<40x16xf32, #tpu.memory_space<vmem>>, vector<8x16xf32>
    %2 = vector.extract_strided_slice %1 {offsets = [0, 0], sizes = [1, 16], strides = [1, 1]} : vector<8x16xf32> to vector<1x16xf32>
    %3 = vector.extract_strided_slice %1 {offsets = [1, 0], sizes = [1, 16], strides = [1, 1]} : vector<8x16xf32> to vector<1x16xf32>
    %4 = vector.extract_strided_slice %1 {offsets = [2, 0], sizes = [1, 16], strides = [1, 1]} : vector<8x16xf32> to vector<1x16xf32>
    %5 = vector.extract_strided_slice %1 {offsets = [3, 0], sizes = [1, 16], strides = [1, 1]} : vector<8x16xf32> to vector<1x16xf32>
    %c8 = arith.constant 8 : index
    %c0_3 = arith.constant 0 : index
    %6 = vector.load %arg2[%c8, %c0_3] : memref<40x16xf32, #tpu.memory_space<vmem>>, vector<16x16xf32>
    %c24 = arith.constant 24 : index
    %c0_4 = arith.constant 0 : index
    %7 = vector.load %arg2[%c24, %c0_4] : memref<40x16xf32, #tpu.memory_space<vmem>>, vector<16x16xf32>
    %8 = vector.broadcast %0 : vector<16x1xf32> to vector<16x16xf32>
    %9 = vector.broadcast %4 : vector<1x16xf32> to vector<16x16xf32>
    %10 = arith.mulf %8, %9 : vector<16x16xf32>
    %11 = vector.broadcast %5 : vector<1x16xf32> to vector<16x16xf32>
    %12 = arith.addf %10, %11 : vector<16x16xf32>
    %13 = math.sin %12 : vector<16x16xf32>
    %14 = vector.broadcast %0 : vector<16x1xf32> to vector<16x16xf32>
    %15 = vector.broadcast %2 : vector<1x16xf32> to vector<16x16xf32>
    %16 = arith.mulf %14, %15 : vector<16x16xf32>
    %17 = vector.broadcast %3 : vector<1x16xf32> to vector<16x16xf32>
    %18 = arith.addf %16, %17 : vector<16x16xf32>
    %cst = arith.constant dense<0.000000e+00> : vector<16x16xf32>
    %19 = tpu.matmul %13, %6, %cst {dimension_numbers = #tpu.dot_dimension_numbers<[1], [0], [0], [1], [0, 0, 1, 1], [], []>} : vector<16x16xf32>, vector<16x16xf32>, vector<16x16xf32> -> vector<16x16xf32>
    %20 = arith.addf %18, %19 : vector<16x16xf32>
    %cst_5 = arith.constant dense<0.000000e+00> : vector<16x16xf32>
    %21 = tpu.matmul %20, %7, %cst_5 {dimension_numbers = #tpu.dot_dimension_numbers<[1], [0], [0], [1], [0, 0, 1, 1], [], []>} : vector<16x16xf32>, vector<16x16xf32>, vector<16x16xf32> -> vector<16x16xf32>
    %cst_6 = arith.constant dense<0xFF800000> : vector<16xf32>
    %22 = vector.multi_reduction <maximumf>, %21, %cst_6 [1] : vector<16x16xf32> to vector<16xf32>
    %23 = vector.shape_cast %22 : vector<16xf32> to vector<16x1xf32>
    %24 = vector.broadcast %23 : vector<16x1xf32> to vector<16x16xf32>
    %25 = arith.subf %21, %24 : vector<16x16xf32>
    %26 = math.exp %25 : vector<16x16xf32>
    %cst_7 = arith.constant dense<0.000000e+00> : vector<16xf32>
    %27 = vector.multi_reduction <add>, %26, %cst_7 [1] : vector<16x16xf32> to vector<16xf32>
    %28 = vector.shape_cast %27 : vector<16xf32> to vector<16x1xf32>
    %cst_8 = arith.constant 1.000000e+00 : f32
    %29 = vector.broadcast %cst_8 : f32 to vector<16x1xf32>
    %30 = arith.divf %29, %28 : vector<16x1xf32>
    %31 = vector.shape_cast %26 : vector<16x16xf32> to vector<2x8x16xf32>
    %c0_9 = arith.constant 0 : index
    %c0_10 = arith.constant 0 : index
    %c0_11 = arith.constant 0 : index
    %32 = vector.load %arg4[%c0_9, %c0_10, %c0_11] : memref<2x16x4xf32, #tpu.memory_space<vmem>>, vector<2x16x4xf32>
    %cst_12 = arith.constant dense<0.000000e+00> : vector<2x8x4xf32>
    %33 = tpu.matmul %31, %32, %cst_12 {dimension_numbers = #tpu.dot_dimension_numbers<[2], [1], [1], [2], [0, 0, 0, 1, 1, 2], [0], [0]>} : vector<2x8x16xf32>, vector<2x16x4xf32>, vector<2x8x4xf32> -> vector<2x8x4xf32>
    %34 = vector.shape_cast %33 : vector<2x8x4xf32> to vector<16x4xf32>
    %35 = vector.broadcast %30 : vector<16x1xf32> to vector<16x4xf32>
    %36 = arith.mulf %34, %35 : vector<16x4xf32>
    %c0_13 = arith.constant 0 : index
    %c0_14 = arith.constant 0 : index
    %37 = vector.load %arg3[%c0_13, %c0_14] : memref<144x128xf32, #tpu.memory_space<vmem>>, vector<4x128xf32>
    %c8_15 = arith.constant 8 : index
    %c0_16 = arith.constant 0 : index
    %38 = vector.load %arg3[%c8_15, %c0_16] : memref<144x128xf32, #tpu.memory_space<vmem>>, vector<128x128xf32>
    %c136 = arith.constant 136 : index
    %c0_17 = arith.constant 0 : index
    %39 = vector.load %arg3[%c136, %c0_17] : memref<144x128xf32, #tpu.memory_space<vmem>>, vector<1x128xf32>
    %c137 = arith.constant 137 : index
    %c0_18 = arith.constant 0 : index
    %40 = vector.load %arg3[%c137, %c0_18] : memref<144x128xf32, #tpu.memory_space<vmem>>, vector<1x128xf32>
    %cst_19 = arith.constant dense<0.000000e+00> : vector<16x128xf32>
    %41 = tpu.matmul %36, %37, %cst_19 {dimension_numbers = #tpu.dot_dimension_numbers<[1], [0], [0], [1], [0, 0, 1, 1], [], []>} : vector<16x4xf32>, vector<4x128xf32>, vector<16x128xf32> -> vector<16x128xf32>
    %42 = vector.broadcast %39 : vector<1x128xf32> to vector<16x128xf32>
    %43 = arith.addf %41, %42 : vector<16x128xf32>
    %cst_20 = arith.constant 0.000000e+00 : f32
    %44 = vector.broadcast %cst_20 : f32 to vector<16x128xf32>
    %45 = arith.maximumf %43, %44 : vector<16x128xf32>
    %cst_21 = arith.constant dense<0.000000e+00> : vector<16x128xf32>
    %46 = tpu.matmul %45, %38, %cst_21 {dimension_numbers = #tpu.dot_dimension_numbers<[1], [0], [0], [1], [0, 0, 1, 1], [], []>} : vector<16x128xf32>, vector<128x128xf32>, vector<16x128xf32> -> vector<16x128xf32>
    %47 = vector.broadcast %40 : vector<1x128xf32> to vector<16x128xf32>
    %48 = arith.addf %46, %47 : vector<16x128xf32>
    %49 = vector.shape_cast %48 : vector<16x128xf32> to vector<2x8x128xf32>
    %c0_22 = arith.constant 0 : index
    %c0_23 = arith.constant 0 : index
    %c0_24 = arith.constant 0 : index
    %50 = vector.load %arg5[%c0_22, %c0_23, %c0_24] : memref<2x8x128xf32, #tpu.memory_space<vmem>>, vector<2x8x128xf32>
    tpu.vector_store %arg5[%c0_22, %c0_23, %c0_24], %49 {strides = array<i32>} : memref<2x8x128xf32, #tpu.memory_space<vmem>>, vector<2x8x128xf32>,
    return
  }
  func.func @transform_0(%arg0: i32) -> (i32, i32) {
    %c0_i32 = arith.constant 0 : i32
    %c0_i32_0 = arith.constant 0 : i32
    %c0_i32_1 = arith.constant 0 : i32
    return %c0_i32, %c0_i32_0 : i32, i32
  }
  func.func @transform_1(%arg0: i32) -> (i32, i32) {
    %c0_i32 = arith.constant 0 : i32
    %c0_i32_0 = arith.constant 0 : i32
    %c0_i32_1 = arith.constant 0 : i32
    return %c0_i32, %c0_i32_0 : i32, i32
  }
  func.func @transform_2(%arg0: i32) -> (i32, i32) {
    %c0_i32 = arith.constant 0 : i32
    %c0_i32_0 = arith.constant 0 : i32
    %c0_i32_1 = arith.constant 0 : i32
    return %c0_i32, %c0_i32_0 : i32, i32
  }
  func.func @transform_3(%arg0: i32) -> (i32, i32, i32) {
    %c0_i32 = arith.constant 0 : i32
    %c0_i32_0 = arith.constant 0 : i32
    %c0_i32_1 = arith.constant 0 : i32
    %c0_i32_2 = arith.constant 0 : i32
    return %c0_i32, %c0_i32_0, %c0_i32_1 : i32, i32, i32
  }
  func.func @transform_4(%arg0: i32) -> (i32, i32, i32) {
    %c0_i32 = arith.constant 0 : i32
    %c0_i32_0 = arith.constant 0 : i32
    %c0_i32_1 = arith.constant 0 : i32
    %c0_i32_2 = arith.constant 0 : i32
    return %c0_i32, %c0_i32_0, %c0_i32_1 : i32, i32, i32
  }
}

</mosaic_0001>

<bundles_post_ra>
// kernel: forward.1
= control target key start
LH: loop header
LB: loop body
LE: loop exit
PB: predicated region body
PF: predicated region fallthrough
CT: control target
= control target key end

     0   :  { %9 = vsyncpa [#allocation3], 0  ;;  %s1046_s15 = smov [#allocation2]   ;;  %s1220_s0 = inlined_call_operand.vmem [shape: f32[16,1], index: 0, kind: input, shape index: {}]   ;;  %s1221_s1 = inlined_call_operand.vmem [shape: f32[40,16], index: 1, kind: input, shape index: {}]   ;;  %s1222_s2 = inlined_call_operand.hbm [shape: f32[144,128], index: 2, kind: input, shape index: {}]   ;;  %s1223_s3 = inlined_call_operand.vmem [shape: f32[2,16,4], index: 3, kind: input, shape index: {}]   ;;  %s1224_s4 = inlined_call_operand.vmem [shape: f32[2,8,128], index: 4, kind: output, shape index: {}]  }
   0x1   :  { %s19_s16 = sshll.u32 %s1046_s15, 4  ;;  %s1022_s19 = scalar_lea.hbm %s1222_s2, 2304  ;;  %s20_s16 = int_to_ptr.vmem [resolvable:$true] %s19_s16 }
   0x2   :  { %p1023_p0 = scmp.ne.s32.totalorder %s1222_s2, %s1022_s19  ;;  %p1026_p1 = scmp.lt.u32.totalorder %s1022_s19, %s1222_s2 }
   0x4   :  { %p1028_p2 = pnand %p1026_p1, %p1023_p0 }
   0x6   :  { %1031 = shalt.err (!%p1028_p2)
}
   0x7   :  { %s1032_s24 = scalar_lea.vmem %s20_s16, 2304  ;;  %p1037_p4 = scmp.lt.s32.totalorder %s20_s16, %s20_s16 }
   0x8   :  { %p1033_p3 = scmp.ne.s32.totalorder %s20_s16, %s1032_s24  ;;  %p1038_p5 = scmp.lt.s32.totalorder %s1032_s24, %s1032_s24 }
   0xa   :  { %p1039_p6 = por %p1038_p5, %p1037_p4 }
   0xc   :  { %p1040_p7 = pnand %p1039_p6, %p1033_p3 }
   0xe   :  { %1043 = shalt.err (!%p1040_p7)
}
   0xf   :  { %s1047_s25 = smov 128   ;;  %s1048_s26 = smov 8  }
  0x10   :  { %25 = dma.hbm_to_vmem [thread:$0]  %s1222_s2, 2304, %s20_s16, [#allocation3], %s1047_s25, %s1047_s25, %s1048_s26  }
  0x11   :  { %1044 = dma.done.wait [#allocation3], 2304  }
  0x12   :  { %1045 = vsyncadd [#allocation3], 4294964992  ;;  %v48_v0 = vlaneseq  ;;  %v1049_v1 = vmov 0   ;;  %v31_v4 = vld [vmem:[%s1220_s0] sm:$0xff]  ;;  %v32_v7 = vld [vmem:[%s1220_s0 + $0x8] sm:$0xff] }
  0x13   :  { %1005 = vset.pattern.permute.xlu0 %v1049_v1  ;;  %v33_v5 = vld [vmem:[%s1221_s1] sm:$0xff]  ;;  %v34_v10 = vld [vmem:[%s1221_s1 + $0x8] sm:$0xff]  ;;  %v35_v11 = vld [vmem:[%s1221_s1 + $0x10] sm:$0xff]  ;;  %v1050_v45 = vmov 683565275  }
  0x14   :  { %v49_v2 = vshrl.u32 %v48_v0, 7  ;;  %40 = vperm.xlu0 %1005, %v31_v4   ;;  %v938_v12 = vpack.c.bf16 %v35_v11, %v34_v10  ;;  %v1051_v48 = vmov 2475754826   ;;  %v1052_v50 = vmov 2131351028  }
  0x15   :  { %v1053_v52 = vmov 2102212464   ;;  %v1054_v57 = vmov 920167782   ;;  %v1055_v62 = vmov 1326507024  }
  0x16   :  { %v270_v3 = vsub.s32 0, %v49_v2  ;;  %v276_v8 = vsub.s32 1, %v49_v2  ;;  %939 = vmatprep.subr.bf16.mxu0 %v938_v12  ;;  %v50_v13 = vsub.s32 2, %v49_v2  ;;  %v56_v14 = vsub.s32 3, %v49_v2 }
  0x17   :  { %941 = vmatpush3.bf16.msra.mxu0 %v938_v12 }
  0x18   :  { %v271_v6 = vrot.slane %v33_v5, %v270_v3  ;;  %45 = vperm.xlu0 %1005, %v32_v7   ;;  %v277_v9 = vrot.slane %v33_v5, %v276_v8  ;;  %v51_v15 = vrot.slane %v33_v5, %v50_v13  ;;  %v57_v16 = vrot.slane %v33_v5, %v56_v14 }
  0x93   :  { %v41_v17 = vpop.permute.xlu0 %40 }
  0x94   :  { %v52_v18 = vmul.f32 %v51_v15, %v41_v17  ;;  %v272_v19 = vmul.f32 %v271_v6, %v41_v17 }
  0x96   :  { %v1111_v20 = vadd.f32 %v57_v16, %v52_v18  ;;  %v1113_v21 = vadd.f32 %v277_v9, %v272_v19 }
  0x97   :  { %v46_v22 = vpop.permute.xlu0 %45 }
  0x98   :  { %v63_v23 = vand.u32 2139095040, %v1111_v20  ;;  %v53_v24 = vmul.f32 %v51_v15, %v46_v22  ;;  %v273_v25 = vmul.f32 %v271_v6, %v46_v22  ;;  %v60_v28 = vand.u32 2147483647, %v1111_v20 }
  0x99   :  { %vm62_vm14 = vcmp.lt.s32.totalorder %v1111_v20, 0 }
  0x9a   :  { %v64_v26 = vshrl.u32 %v63_v23, 23  ;;  %v1116_v27 = vadd.f32 %v57_v16, %v53_v24  ;;  %v1119_v29 = vadd.f32 %v277_v9, %v273_v25  ;;  %v67_v35 = vand.u32 8388607, %v60_v28 }
  0x9b   :  { %vm61_vm15 = vcmp.le.f32.partialorder %v60_v28, 0.7853982 }
  0x9c   :  { %v816_v30 = vadd.s32 4294967169, %v64_v26  ;;  %v167_v31 = vand.u32 2139095040, %v1116_v27  ;;  %v164_v32 = vand.u32 2147483647, %v1116_v27  ;;  %v68_v41 = vor.u32 8388608, %v67_v35 }
  0x9e   :  { %v70_v33 = vadd.s32 1, %v816_v30  ;;  %v168_v34 = vshrl.u32 %v167_v31, 23  ;;  %v171_v36 = vand.u32 8388607, %v164_v32  ;;  %v108_v12 = vshll.u32 %v68_v41, 8 }
  0xa0   :  { %vm71_vm0 = vcmp.gt.s32.totalorder %v70_v33, 0  ;;  %v820_v37 = vadd.s32 4294967169, %v168_v34  ;;  %v172_v42 = vor.u32 8388608, %v171_v36 }
  0xa1   :  { %v72_v38 = vsel %vm71_vm0, %v70_v33, 0  ;;  %vm166_vm0 = vcmp.lt.s32.totalorder %v1116_v27, 0 }
  0xa2   :  { %v74_v39 = vand.u32 31, %v72_v38  ;;  %v174_v40 = vadd.s32 1, %v820_v37  ;;  %v73_v43 = vshrl.u32 %v72_v38, 5  ;;  %v212_v24 = vshll.u32 %v172_v42, 8 }
  0xa4   :  { %v75_v44 = vsub.s32 32, %v74_v39  ;;  %vm175_vm1 = vcmp.gt.s32.totalorder %v174_v40, 0  ;;  %v77_v46 = vshll.u32 %v1050_v45, %v74_v39  ;;  %v80_v49 = vshll.u32 %v1051_v48, %v74_v39 }
  0xa5   :  { %v176_v47 = vsel %vm175_vm1, %v174_v40, 0  ;;  %v83_v51 = vshll.u32 %v1052_v50, %v74_v39  ;;  %v86_v53 = vshll.u32 %v1053_v52, %v74_v39  ;;  %v89_v58 = vshll.u32 %v1054_v57, %v74_v39 }
  0xa6   :  { %v1128_v54 = vshrl.u32 %v176_v47, 5  ;;  %v178_v55 = vand.u32 31, %v176_v47  ;;  %v78_v56 = vshrl.u32 %v1051_v48, %v75_v44  ;;  %v81_v59 = vshrl.u32 %v1052_v50, %v75_v44 }
  0xa7   :  { %v84_v60 = vshrl.u32 %v1053_v52, %v75_v44  ;;  %v87_v61 = vshrl.u32 %v1054_v57, %v75_v44  ;;  %v90_v63 = vshrl.u32 %v1055_v62, %v75_v44  ;;  %v76_v3 = vshrl.u32 %v1050_v45, %v75_v44 }
  0xa8   :  { %v179_v0 = vsub.s32 32, %v178_v55  ;;  %v190_v1 = vshll.u32 %v1053_v52, %v178_v55  ;;  %v193_v2 = vshll.u32 %v1054_v57, %v178_v55  ;;  %v79_v4 = vor.u32 %v78_v56, %v77_v46 }
  0xa9   :  { %v82_v5 = vor.u32 %v81_v59, %v80_v49  ;;  %v85_v6 = vor.u32 %v84_v60, %v83_v51  ;;  %v88_v7 = vor.u32 %v87_v61, %v86_v53  ;;  %v91_v10 = vor.u32 %v90_v63, %v89_v58 }
  0xaa   :  { %v191_v8 = vshrl.u32 %v1054_v57, %v179_v0  ;;  %v194_v9 = vshrl.u32 %v1055_v62, %v179_v0  ;;  %vm92_vm2 = vcmp.lt.s32.totalorder %v73_v43, 1  ;;  %vm94_vm3 = vcmp.lt.s32.totalorder %v73_v43, 3 }
  0xab   :  { %vm95_vm4 = vcmp.lt.s32.totalorder %v73_v43, 4  ;;  %v96_v11 = vsel %vm92_vm2, %v76_v3, %v79_v4  ;;  %v100_v16 = vsel %vm92_vm2, %v79_v4, %v82_v5  ;;  %v104_v19 = vsel %vm92_vm2, %v82_v5, %v85_v6 }
  0xac   :  { %v192_v13 = vor.u32 %v191_v8, %v190_v1  ;;  %v195_v14 = vor.u32 %v194_v9, %v193_v2  ;;  %v97_v15 = vsel %vm95_vm4, %v85_v6, 2102212464  ;;  %v101_v18 = vsel %vm95_vm4, %v88_v7, 920167782 }
  0xad   :  { %v98_v17 = vsel %vm94_vm3, %v82_v5, %v97_v15  ;;  %v105_v22 = vsel %vm95_vm4, %v91_v10, 1326507024  ;;  %vm199_vm5 = vcmp.lt.s32.totalorder %v1128_v54, 4  ;;  %vm93_vm6 = vcmp.lt.s32.totalorder %v73_v43, 2 }
  0xae   :  { %v102_v23 = vsel %vm94_vm3, %v85_v6, %v101_v18  ;;  %v205_v25 = vsel %vm199_vm5, %v192_v13, 920167782  ;;  %v209_v26 = vsel %vm199_vm5, %v195_v14, 1326507024  ;;  %v106_v31 = vsel %vm94_vm3, %v88_v7, %v105_v22 }
  0xaf   :  { %v103_v30 = vsel %vm93_vm6, %v100_v16, %v102_v23  ;;  %v99_v33 = vsel %vm93_vm6, %v96_v11, %v98_v17  ;;  %v107_v34 = vsel %vm93_vm6, %v104_v19, %v106_v31  ;;  %v181_v39 = vshll.u32 %v1050_v45, %v178_v55 }
  0xb0   :  { %v1139_v35 = vmul.u32.u64.low %v108_v12, %v103_v30  ;;  %v1140_v36 = vmul.u32.u64.high %v108_v12, %v103_v30, %v1139_v35  ;;  %v1142_v37 = vmul.u32.u64.low %v108_v12, %v107_v34  ;;  %v1143_v38 = vmul.u32.u64.high %v108_v12, %v107_v34, %v1142_v37 }
  0xb1   :  { %v182_v40 = vshrl.u32 %v1051_v48, %v179_v0  ;;  %v184_v41 = vshll.u32 %v1051_v48, %v178_v55  ;;  %v185_v42 = vshrl.u32 %v1052_v50, %v179_v0  ;;  %v187_v44 = vshll.u32 %v1052_v50, %v178_v55 }
  0xb2   :  { %v188_v46 = vshrl.u32 %v1053_v52, %v179_v0  ;;  %v115_v47 = vmul.u32 %v108_v12, %v99_v33  ;;  %v180_v49 = vshrl.u32 %v1050_v45, %v179_v0  ;;  %vm196_vm7 = vcmp.lt.s32.totalorder %v1128_v54, 1 }
  0xb3   :  { %v183_v43 = vor.u32 %v182_v40, %v181_v39  ;;  %v118_v51 = vadd.s32 1, %v1140_v36  ;;  %v186_v53 = vor.u32 %v185_v42, %v184_v41  ;;  %vm198_vm8 = vcmp.lt.s32.totalorder %v1128_v54, 3 }
  0xb4   :  { %v189_v56 = vor.u32 %v188_v46, %v187_v44  ;;  %vm117_vm9 = vc.u32 %v1143_v38, %v1139_v35  ;;  %vm197_vm10 = vcmp.lt.s32.totalorder %v1128_v54, 2  ;;  %v210_v50 = vsel %vm198_vm8, %v192_v13, %v209_v26 }
  0xb5   :  { %v200_v48 = vsel %vm196_vm7, %v180_v49, %v183_v43  ;;  %v119_v52 = vsel %vm117_vm9, %v118_v51, %v1140_v36  ;;  %v204_v55 = vsel %vm196_vm7, %v183_v43, %v186_v53  ;;  %v116_v23 = vadd.s32 %v1139_v35, %v1143_v38 }
  0xb6   :  { %v201_v45 = vsel %vm199_vm5, %v189_v56, 2102212464  ;;  %v206_v57 = vsel %vm198_vm8, %v189_v56, %v205_v25  ;;  %v120_v58 = vadd.s32 %v119_v52, %v115_v47  ;;  %v208_v61 = vsel %vm196_vm7, %v186_v53, %v189_v56 }
  0xb7   :  { %v202_v59 = vsel %vm198_vm8, %v186_v53, %v201_v45  ;;  %v207_v60 = vsel %vm197_vm10, %v204_v55, %v206_v57  ;;  %v211_v62 = vsel %vm197_vm10, %v208_v61, %v210_v50  ;;  %vm165_vm1 = vcmp.le.f32.partialorder %v164_v32, 0.7853982 }
  0xb8   :  { %v1161_v63 = vmul.u32.u64.low %v212_v24, %v207_v60  ;;  %v1162_v0 = vmul.u32.u64.high %v212_v24, %v207_v60, %v1161_v63  ;;  %v121_v1 = vadd.s32 536870912, %v120_v58  ;;  %v203_v4 = vsel %vm197_vm10, %v200_v48, %v202_v59 }
  0xb9   :  { %v1164_v2 = vmul.u32.u64.low %v212_v24, %v211_v62  ;;  %v1165_v3 = vmul.u32.u64.high %v212_v24, %v211_v62, %v1164_v2  ;;  %v219_v8 = vmul.u32 %v212_v24, %v203_v4  ;;  %vm280_vm5 = vcmask 130048  }
  0xba   :  { %v122_v5 = vshrl.u32 %v121_v1, 30  ;;  %v222_v6 = vadd.s32 1, %v1162_v0  ;;  %vm152_vm6 = vweird.f32 %v1111_v20  ;;  %vm256_vm10 = vweird.f32 %v1116_v27 }
  0xbb   :  { %vm221_vm11 = vc.u32 %v1165_v3, %v1161_v63  ;;  %v220_v46 = vadd.s32 %v1161_v63, %v1165_v3 }
  0xbc   :  { %v123_v7 = vshll.u32 %v122_v5, 30  ;;  %v223_v9 = vsel %vm221_vm11, %v222_v6, %v1162_v0  ;;  %v146_v38 = vsub.s32 4, %v122_v5  ;;  %vm1057_vm11 = vmmov 0  }
  0xbd   :  { %v224_v10 = vadd.s32 %v223_v9, %v219_v8 }
  0xbe   :  { %v124_v54 = vsub.s32 %v120_v58, %v123_v7  ;;  %v147_v45 = vsel %vm62_vm14, %v146_v38, %v122_v5  ;;  %v470_v38 = vld [vmem:[%s1223_s3 + $0x18] sm:$0xff] }
  0xbf   :  { %v225_v12 = vadd.s32 536870912, %v224_v10  ;;  %v149_v58 = vsel %vm61_vm15, 0, %v147_v45  ;;  %v621_v45 = vld [vmem:[#allocation2 + $0x10] sm:$0xff] }
  0xc0   :  { %v126_v11 = vsub.s32 0, %v124_v54  ;;  %v153_v63 = vadd.s32 3, %v149_v58  ;;  %v623_v58 = vld [vmem:[#allocation2 + $0x20] sm:$0xff] }
  0xc1   :  { %v226_v14 = vshrl.u32 %v225_v12, 30 }
  0xc2   :  { %v817_v13 = vmin.u32 %v126_v11, %v124_v54  ;;  %v154_v2 = vand.u32 3, %v153_v63  ;;  %v626_v63 = vld [vmem:[#allocation2 + $0x38] sm:$0xff] }
  0xc3   :  { %v227_v16 = vshll.u32 %v226_v14, 30  ;;  %v250_v62 = vsub.s32 4, %v226_v14 }
  0xc4   :  { %v128_v15 = vclz %v817_v13  ;;  %vm159_vm2 = vcmp.eq.s32.totalorder %v154_v2, 2  ;;  %vm156_vm3 = vcmp.eq.s32.totalorder %v154_v2, 0  ;;  %vm155_vm4 = vcmp.lt.s32.totalorder %v154_v2, 2  ;;  %v629_v2 = vld [vmem:[#allocation2 + $0x50] sm:$0xff] }
  0xc5   :  { %v228_v18 = vsub.s32 %v224_v10, %v227_v16  ;;  %v251_v1 = vsel %vm166_vm0, %v250_v62, %v226_v14 }
  0xc6   :  { %v818_v17 = vadd.s32 4294967294, %v128_v15  ;;  %v253_v5 = vsel %vm165_vm1, 0, %v251_v1  ;;  %v628_v1 = vld [vmem:[#allocation2 + $0x48] sm:$0xff] }
  0xc7   :  { %v230_v22 = vsub.s32 0, %v228_v18 }
  0xc8   :  { %vm819_vm12 = vcmp.lt.s32.totalorder %v818_v17, 0 }
  0xc9   :  { %v131_v19 = vsel %vm819_vm12, 0, %v818_v17  ;;  %v821_v26 = vmin.u32 %v230_v22, %v228_v18  ;;  %vm649_vm12 = vcmask 1043456  }
  0xca   :  { %v132_v24 = vsub.s32 32, %v131_v19  ;;  %v136_v25 = vsub.s32 4294967266, %v131_v19  ;;  %v133_v30 = vshll.u32 %v124_v54, %v131_v19  ;;  %v257_v54 = vadd.s32 3, %v253_v5  ;;  %v631_v5 = vld [vmem:[#allocation2 + $0x60] sm:$0xff] }
  0xcb   :  { %v232_v34 = vclz %v821_v26 }
  0xcc   :  { %v134_v31 = vshrl.u32 %v116_v23, %v132_v24  ;;  %v137_v33 = vadd.s32 127, %v136_v25  ;;  %v258_v12 = vand.u32 3, %v257_v54  ;;  %v37_v23 = vld [vmem:[%s1221_s1 + $0x20] sm:$0xff] }
  0xcd   :  { %v822_v39 = vadd.s32 4294967294, %v232_v34 }
  0xce   :  { %v135_v36 = vor.u32 %v134_v31, %v133_v30  ;;  %v138_v37 = vshll.u32 %v137_v33, 23  ;;  %vm263_vm7 = vcmp.eq.s32.totalorder %v258_v12, 2  ;;  %vm260_vm8 = vcmp.eq.s32.totalorder %v258_v12, 0 }
  0xcf   :  { %vm823_vm13 = vcmp.lt.s32.totalorder %v822_v39, 0  ;;  %vm259_vm9 = vcmp.lt.s32.totalorder %v258_v12, 2 }
  0xd0   :  { %v139_v40 = vor.u32 4788187, %v138_v37  ;;  %v142_v42 = vcvt.s32.f32 %v135_v36  ;;  %v235_v44 = vsel %vm823_vm13, 0, %v822_v39  ;;  %v467_v37 = vld [vmem:[%s1223_s3] sm:$0xff]  ;;  %vm642_vm13 = vcmask 31744  }
  0xd1   :  { %v236_v47 = vsub.s32 32, %v235_v44  ;;  %v240_v49 = vsub.s32 4294967266, %v235_v44  ;;  %v237_v43 = vshll.u32 %v228_v18, %v235_v44 }
  0xd2   :  { %v140_v41 = vand.u32 2147483647, %v139_v40  ;;  %v1058_v40 = vmov 0.0  }
  0xd3   :  { %v238_v51 = vshrl.u32 %v220_v46, %v236_v47  ;;  %v241_v53 = vadd.s32 127, %v240_v49 }
  0xd4   :  { %v143_v35 = vmul.f32 %v142_v42, %v140_v41 }
  0xd5   :  { %v239_v48 = vor.u32 %v238_v51, %v237_v43  ;;  %v242_v50 = vshll.u32 %v241_v53, 23 }
  0xd6   :  { %v144_v56 = vxor.u32 2147483648, %v143_v35 }
  0xd7   :  { %v243_v57 = vor.u32 4788187, %v242_v50  ;;  %v246_v60 = vcvt.s32.f32 %v239_v48  ;;  %v619_v50 = vld [vmem:[#allocation2] sm:$0xf] }
  0xd8   :  { %v145_v52 = vsel %vm62_vm14, %v144_v56, %v143_v35  ;;  %v469_v35 = vld [vmem:[%s1223_s3 + $0x10] sm:$0xff] }
  0xd9   :  { %v148_v55 = vsel %vm61_vm15, %v1111_v20, %v145_v52  ;;  %v244_v59 = vand.u32 2147483647, %v243_v57  ;;  %v36_v20 = vld [vmem:[%s1221_s1 + $0x18] sm:$0xff]  ;;  %v950_v43 = vpack.c.bf16 %v470_v38, %v469_v35  ;;  %v620_v52 = vld [vmem:[#allocation2 + $0x8] sm:$0xff] }
  0xda   :  { %1006 = vcosq.f32 %v148_v55  ;;  %v942_v24 = vpack.c.bf16 %v37_v23, %v36_v20  ;;  %v952_v57 = vpack.c.bf16 %v621_v45, %v620_v52  ;;  %v830_v20 = vld [vmem:[#allocation2 + $0x88] ss:$0 sm:$0xff] }
  0xdb   :  { %1008 = vsinq.f32 %v148_v55  ;;  %v247_v61 = vmul.f32 %v246_v60, %v244_v59  ;;  %v622_v55 = vld [vmem:[#allocation2 + $0x18] sm:$0xff]  ;;  %v624_v60 = vld [vmem:[#allocation2 + $0x28] sm:$0xff] }
  0xdc   :  { %943 = vmatprep.subr.bf16.mxu0 %v942_v24  ;;  %v956_v59 = vpack.c.bf16 %v623_v58, %v622_v55  ;;  %953 = vmatprep.subr.bf16.mxu1 %v952_v57 }
  0xdd   :  { %v248_v0 = vxor.u32 2147483648, %v247_v61  ;;  %955 = vmatpush3.bf16.msra.mxu1 %v952_v57 }
  0xde   :  { %957 = vmatprep.subr.bf16.mxu1 %v956_v59 }
  0xdf   :  { %v249_v28 = vsel %vm166_vm0, %v248_v0, %v247_v61  ;;  %v625_v61 = vld [vmem:[#allocation2 + $0x30] sm:$0xff]  ;;  %v627_v0 = vld [vmem:[#allocation2 + $0x40] sm:$0xff] }
  0xe0   :  { %v252_v3 = vsel %vm165_vm1, %v1116_v27, %v249_v28  ;;  %v960_v62 = vpack.c.bf16 %v625_v61, %v624_v60  ;;  %v964_v28 = vpack.c.bf16 %v627_v0, %v626_v63 }
  0xe1   :  { %1010 = vcosq.f32 %v252_v3  ;;  %959 = vmatpush3.bf16.msra.mxu1 %v956_v59 }
  0xe2   :  { %1012 = vsinq.f32 %v252_v3  ;;  %961 = vmatprep.subr.bf16.mxu1 %v960_v62  ;;  %v968_v3 = vpack.c.bf16 %v629_v2, %v628_v1 }
  0xe4   :  { %v1007_v4 = vpop.eup %1006 }
  0xe5   :  { %v1009_v6 = vpop.eup %1008  ;;  %v160_v7 = vxor.u32 2147483648, %v1007_v4  ;;  %963 = vmatpush3.bf16.msra.mxu1 %v960_v62 }
  0xe6   :  { %v157_v8 = vxor.u32 2147483648, %v1009_v6  ;;  %965 = vmatprep.subr.bf16.mxu1 %v964_v28 }
  0xe7   :  { %v161_v9 = vsel %vm159_vm2, %v160_v7, %v1009_v6  ;;  %v632_v7 = vld [vmem:[#allocation2 + $0x68] sm:$0xff] }
  0xe8   :  { %v158_v10 = vsel %vm156_vm3, %v1007_v4, %v157_v8  ;;  %v630_v4 = vld [vmem:[#allocation2 + $0x58] sm:$0xff]  ;;  %v633_v8 = vld [vmem:[#allocation2 + $0x70] sm:$0xff] }
  0xe9   :  { %v162_v32 = vsel %vm155_vm4, %v158_v10, %v161_v9  ;;  %967 = vmatpush3.bf16.msra.mxu1 %v964_v28  ;;  %v972_v6 = vpack.c.bf16 %v631_v5, %v630_v4  ;;  %v976_v9 = vpack.c.bf16 %v633_v8, %v632_v7 }
  0xea   :  { %v163_v11 = vsel %vm152_vm6, nan, %v162_v32  ;;  %969 = vmatprep.subr.bf16.mxu1 %v968_v3 }
  0xeb   :  { %874 = vmatprep.mubr.msk.f32.mxu0 %vm280_vm5, %v163_v11  ;;  %v1011_v13 = vpop.eup %1010 }
  0xec   :  { %v1013_v14 = vpop.eup %1012  ;;  %v264_v15 = vxor.u32 2147483648, %v1011_v13 }
  0xed   :  { %v261_v16 = vxor.u32 2147483648, %v1013_v14  ;;  %971 = vmatpush3.bf16.msra.mxu1 %v968_v3 }
  0xee   :  { %v265_v17 = vsel %vm263_vm7, %v264_v15, %v1013_v14  ;;  %973 = vmatprep.subr.bf16.mxu1 %v972_v6 }
  0xef   :  { %v262_v18 = vsel %vm260_vm8, %v1011_v13, %v261_v16 }
  0xf0   :  { %v266_v19 = vsel %vm259_vm9, %v262_v18, %v265_v17  ;;  %v634_v18 = vld [vmem:[#allocation2 + $0x78] sm:$0xff] }
  0xf1   :  { %v267_v22 = vsel %vm256_vm10, nan, %v266_v19  ;;  %975 = vmatpush3.bf16.msra.mxu1 %v972_v6  ;;  %v635_v19 = vld [vmem:[#allocation2 + $0x80] sm:$0xff] }
  0xf2   :  { %875 = vmatmul.mubr.msk.f32.vlgmr.msra.gmra.mrb[0].mxu0 %vm280_vm5, %v267_v22  ;;  %977 = vmatprep.subr.bf16.mxu1 %v976_v9  ;;  %v980_v22 = vpack.c.bf16 %v635_v19, %v634_v18 }
  0xf3   :  { %945 = vmatpush3.bf16.msra.mxu0 %v942_v24 }
  0xf5   :  { %979 = vmatpush3.bf16.msra.mxu1 %v976_v9 }
  0xf6   :  { %981 = vmatprep.subr.bf16.mxu1 %v980_v22 }
  0xf9   :  { %983 = vmatpush3.bf16.msra.mxu1 %v980_v22 }
 0x1c5   :  { %v876_v25 = vpop.f32.mrb[0].mxu0 }
 0x1c6   :  { %v363_v26 = vadd.f32 %v876_v25, %v1119_v29  ;;  %v353_v30 = vpop.f32.mrb[1].mxu0  ;;  %v1056_v29 = vmov 0.0|0.0  }
 0x1c7   :  { %v362_v27 = vadd.f32 %v353_v30, %v1113_v21  ;;  %v468_v21 = vld [vmem:[%s1223_s3 + $0x8] sm:$0xff]  ;;  %946 = vmatprep.subr.bf16.mxu0 %v1056_v29 }
 0x1c8   :  { %v947_v39 = vpack.c.bf16 %v468_v21, %v467_v37 }
 0x1c9   :  { %881 = vmatprep.mubr.msk.f32.mxu0 %vm280_vm5, %v362_v27 }
 0x1ca   :  { %882 = vmatmul.mubr.msk.f32.vlgmr.msra.gmra.mrb[2].mxu0 %vm280_vm5, %v363_v26 }
 0x1cb   :  { %888 = vmatprep.mubr.msk.f32.mxu0 %vm1057_vm11, %v1058_v40  ;;  %948 = vmatpush3.bf16.msra.mxu0 %v947_v39 }
 0x1cc   :  { %949 = vmatprep.subr.bf16.mxu0 %v1056_v29 }
 0x29d   :  { %v883_v31 = vpop.f32.mrb[2].mxu0 }
 0x29e   :  { %v436_v33 = vpop.f32.mrb[3].mxu0  ;;  %v448_v36 = vsel %vm280_vm5, %v883_v31, -inf }
 0x29f   :  { %v445_v34 = vsel %vm280_vm5, %v436_v33, -inf }
 0x2a0   :  { %446 = vmax.xlane.f32.xlu1 %v445_v34 }
 0x2a4   :  { %449 = vmax.xlane.f32.xlu1 %v448_v36 }
 0x32d   :  { %v447_v41 = vpop.xlane.xlu1 %446 }
 0x32e   :  { %v451_v42 = vsub.f32 %v436_v33, %v447_v41 }
 0x330   :  { %v453_v44 = vmul.f32 1.442695, %v451_v42 }
 0x331   :  { %v450_v46 = vpop.xlane.xlu1 %449 }
 0x332   :  { %1014 = vpow2.f32 %v453_v44  ;;  %v452_v47 = vsub.f32 %v883_v31, %v450_v46  ;;  %v834_v31 = vld [vmem:[#allocation2 + $0x89] ss:$0 sm:$0xff] }
 0x334   :  { %v455_v49 = vmul.f32 1.442695, %v452_v47 }
 0x336   :  { %1016 = vpow2.f32 %v455_v49 }
 0x33c   :  { %v1015_v51 = vpop.eup %1014 }
 0x33d   :  { %889 = vmatmul.mubr.msk.f32.vlgmr.msra.gmra.mrb[4].mxu0 %vm280_vm5, %v1015_v51  ;;  %v457_v53 = vsel %vm280_vm5, %v1015_v51, 0.0 }
 0x33e   :  { %951 = vmatpush3.bf16.msra.mxu0 %v950_v43  ;;  %458 = vadd.xlane.f32.xlu0 %v457_v53 }
 0x33f   :  { %895 = vmatprep.mubr.msk.f32.mxu0 %vm1057_vm11, %v1058_v40  ;;  %898 = vmatprep.subr.msk.mxu0 %vm649_vm12, %v619_v50 }
 0x340   :  { %v1017_v56 = vpop.eup %1016 }
 0x341   :  { %896 = vmatmul.mubr.msk.f32.vlgmr.msra.gmra.mrb[6].mxu0 %vm280_vm5, %v1017_v56  ;;  %v460_v48 = vsel %vm280_vm5, %v1017_v56, 0.0 }
 0x342   :  { %461 = vadd.xlane.f32.xlu1 %v460_v48  ;;  %899 = vmatpush3.msk.msra.mxu0 %vm649_vm12, %v619_v50 }
 0x3cb   :  { %v459_v54 = vpop.xlane.xlu0 %458 }
 0x3cc   :  { %1018 = vrcp.f32 %v459_v54 }
 0x3cf   :  { %v462_v10 = vpop.xlane.xlu1 %461 }
 0x3d0   :  { %1020 = vrcp.f32 %v462_v10 }
 0x3d6   :  { %v1019_v32 = vpop.eup %1018 }
 0x3da   :  { %v1021_v14 = vpop.eup %1020 }
 0x410   :  { %v540_v11 = vpop.f32.mrb[4].mxu0 }
 0x411   :  { %v617_v12 = vmul.f32 %v1019_v32, %v540_v11  ;;  %v890_v13 = vpop.f32.mrb[5].mxu0 }
 0x413   :  { %900 = vmatprep.mubr.msk.f32.mxu0 %vm642_vm13, %v617_v12 }
 0x414   :  { %v613_v15 = vpop.f32.mrb[6].mxu0 }
 0x415   :  { %v618_v16 = vmul.f32 %v1021_v14, %v613_v15  ;;  %v897_v17 = vpop.f32.mrb[7].mxu0 }
 0x417   :  { %901 = vmatmul.mubr.msk.f32.vlgmr.msra.gmra.mrb[8].mxu0 %vm642_vm13, %v618_v16 }
 0x4ea   :  { %v902_v23 = vpop.f32.mrb[8].mxu0 }
 0x4eb   :  { %v725_v24 = vadd.f32 %v902_v23, %v830_v20  ;;  %v719_v25 = vpop.f32.mrb[9].mxu0 }
 0x4ec   :  { %v720_v26 = vadd.f32 %v830_v20, %v719_v25 }
 0x4ed   :  { %v729_v27 = vmax.f32 %v725_v24, 0.0 }
 0x4ee   :  { %v728_v30 = vmax.f32 %v720_v26, 0.0 }
 0x4f0   :  { %935 = vmatprep.mubr.f32.mxu1 %v728_v30 }
 0x4f1   :  { %936 = vmatmul.mubr.f32.vlgmr.msra.gmra.mrb[0].mxu1 %v729_v27 }
 0x5c4   :  { %v937_v33 = vpop.f32.mrb[0].mxu1 }
 0x5c5   :  { %v806_v34 = vadd.f32 %v937_v33, %v834_v31  ;;  %v800_v36 = vpop.f32.mrb[1].mxu1 }
 0x5c6   :  { %v801_v37 = vadd.f32 %v834_v31, %v800_v36 }
 0x5c7   :  { %810 = vst [vmem:[%s1224_s4 + $0x8] sm:$0xff] %v806_v34 }
 0x5c8   :  { %809 = vst [vmem:[%s1224_s4] sm:$0xff] %v801_v37 }
 0x5c9   :  { %815 = vsyncpa [#allocation3], 1 }

</bundles_post_ra>
